<compile_context>
chip_gen: v5e
topology: v5e:2x2
jax: 0.10.0
libtpu: 0.0.40
codegen_flags: <defaults>
</compile_context>

<pallas_src>
import functools

import jax
import jax.numpy as jnp
from jax import lax
from jax.experimental import pallas as pl
from jax.experimental.pallas import tpu as pltpu

LN_EPS = 1e-5  # nn.LayerNorm default


# ----------------------------- Pallas kernel -------------------------------

def description_adapter_kernel(x_ref, w1_ref, b1_ref, w2_ref, b2_ref,
                               g_ref, beta_ref, o_ref, *, compute_dtype):
    """Fused DescriptionAdapter: FFN (dense_1 -> ReLU -> dropout -> dense_2)
    followed by LayerNorm over the hidden axis, all in one kernel."""
    x = x_ref[...]

    # dense_1 + ReLU  (MXU matmul, f32 accumulation)
    h = jnp.dot(x.astype(compute_dtype), w1_ref[...].astype(compute_dtype),
                preferred_element_type=jnp.float32) + b1_ref[...]
    h = jnp.maximum(h, 0.0)

    # TODO(synk): nn.Dropout(0.3) is implemented as identity (eval semantics);
    # no RNG drop mask in this forward pass.

    # dense_2
    y = jnp.dot(h.astype(compute_dtype), w2_ref[...].astype(compute_dtype),
                preferred_element_type=jnp.float32) + b2_ref[...]

    # LayerNorm over hidden (kept in f32 on the VPU/EUP path).
    mean = jnp.mean(y, axis=-1, keepdims=True)
    yc = y - mean
    var = jnp.mean(yc * yc, axis=-1, keepdims=True)
    inv = lax.rsqrt(var + LN_EPS)
    o_ref[...] = (yc * inv * g_ref[...] + beta_ref[...]).astype(o_ref.dtype)


# ------------------------------ glue wrapper --------------------------------

def description_adapter_apply(cls, kp, *, compute_dtype=jnp.float32):
    """cls: (N, H) f32.  kp: kernel-layout params (pre-transposed weights)."""
    n, h = cls.shape

    # Row tiling for large token counts (keeps v7x within its 64 MiB VMEM and
    # lets the "parallel" grid axis shard across both TensorCores).  Small /
    # non-aligned shapes fall back to a single full-array block, which is
    # always a valid BlockSpec.
    if n % 256 == 0 and h % 128 == 0:
        row_tile = 256
    else:
        row_tile = n
    grid = (n // row_tile,)

    kern = functools.partial(description_adapter_kernel,
                             compute_dtype=compute_dtype)

    return pl.pallas_call(
        kern,
        out_shape=jax.ShapeDtypeStruct((n, h), cls.dtype),
        grid=grid,
        in_specs=[
            pl.BlockSpec((row_tile, h), lambda i: (i, 0)),  # activations tile
            pl.BlockSpec((h, h), lambda i: (0, 0)),          # w1 (resident)
            pl.BlockSpec((1, h), lambda i: (0, 0)),          # b1
            pl.BlockSpec((h, h), lambda i: (0, 0)),          # w2 (resident)
            pl.BlockSpec((1, h), lambda i: (0, 0)),          # b2
            pl.BlockSpec((1, h), lambda i: (0, 0)),          # ln gamma
            pl.BlockSpec((1, h), lambda i: (0, 0)),          # ln beta
        ],
        out_specs=pl.BlockSpec((row_tile, h), lambda i: (i, 0)),
        compiler_params=pltpu.CompilerParams(
            dimension_semantics=("parallel",)),
    )(cls, kp["w1"], kp["b1"], kp["w2"], kp["b2"], kp["ln_g"], kp["ln_b"])


def description_encoder_forward(params, kernel_params, input_ids,
                                attention_mask, *, compute_dtype=jnp.float32):
    # TODO(synk): RobertaModel.from_pretrained has no in-script Pallas
    # equivalent; it is replaced by a deterministic embedding-times-mask stub
    # producing `last_hidden_state` of shape (B, S, H).
    hidden = params["embed"][input_ids] * attention_mask[..., None]   # (B, S, H)
    cls = hidden[:, 0, :]                                              # (B, H)
    return description_adapter_apply(cls, kernel_params,
                                     compute_dtype=compute_dtype)


# ------------------------------- parameters ---------------------------------

def init_params(key, h, vocab):
    """Parameters in PyTorch layout: Linear weights are [out, in]."""
    keys = iter(jax.random.split(key, 8))

    def w(shape, scale=0.02):
        return (scale * jax.random.normal(next(keys), shape)).astype(jnp.float32)

    return {
        "embed": w((vocab, h), 1.0),
        "description_adapter": {
            "w1": w((h, h)), "b1": w((h,)),
            "w2": w((h, h)), "b2": w((h,)),
            "ln_g": jnp.ones((h,), jnp.float32),
            "ln_b": jnp.zeros((h,), jnp.float32),
        },
    }


def prepare_kernel_params(params):
    """One-time layout prep: transpose weights to [in, out], biases to (1, D)."""
    p = params["description_adapter"]
    h = p["w1"].shape[0]
    return {
        "w1": jnp.asarray(p["w1"].T),   "b1": p["b1"].reshape(1, h),
        "w2": jnp.asarray(p["w2"].T),   "b2": p["b2"].reshape(1, h),
        "ln_g": p["ln_g"].reshape(1, h), "ln_b": p["ln_b"].reshape(1, h),
    }


# ---------------------------- reference (checks) -----------------------------

def _reference_forward(params, input_ids, attention_mask):
    p = params["description_adapter"]
    hidden = params["embed"][input_ids] * attention_mask[..., None]
    cls = hidden[:, 0, :]
    x = cls @ p["w1"].T + p["b1"]
    x = jnp.maximum(x, 0.0)
    x = x @ p["w2"].T + p["b2"]
    mean = jnp.mean(x, axis=-1, keepdims=True)
    xc = x - mean
    var = jnp.mean(xc * xc, axis=-1, keepdims=True)
    return xc * lax.rsqrt(var + LN_EPS) * p["ln_g"] + p["ln_b"]


# --------------------------------- main --------------------------------------

if __name__ == "__main__":
    B, S, H, VOCAB = 2, 8, 32, 50
    root = jax.random.PRNGKey(0)
    k_tok, k_par = jax.random.split(root, 2)

    input_ids = jax.random.randint(k_tok, (B, S), 0, VOCAB)
    attention_mask = jnp.ones((B, S), jnp.float32)

    params = init_params(k_par, H, VOCAB)
    kernel_params = prepare_kernel_params(params)   # hoisted layout prep

    out = description_encoder_forward(params, kernel_params,
                                      input_ids, attention_mask)
    out = jax.block_until_ready(out)

    ref = jax.block_until_ready(_reference_forward(params, input_ids,
                                                   attention_mask))

    assert out.shape == (B, H)
    assert jnp.allclose(out, ref, atol=1e-5, rtol=1e-5)
    print("KERNEL_OK")
</pallas_src>

<mosaic_0001>
module attributes {stable_mosaic.version = 11 : i64} {
  func.func @description_adapter_kernel(%arg0: i32, %arg1: memref<2x32xf32, #tpu.memory_space<vmem>>, %arg2: memref<32x32xf32, #tpu.memory_space<vmem>>, %arg3: memref<1x32xf32, #tpu.memory_space<vmem>>, %arg4: memref<32x32xf32, #tpu.memory_space<vmem>>, %arg5: memref<1x32xf32, #tpu.memory_space<vmem>>, %arg6: memref<1x32xf32, #tpu.memory_space<vmem>>, %arg7: memref<1x32xf32, #tpu.memory_space<vmem>>, %arg8: memref<2x32xf32, #tpu.memory_space<vmem>>) attributes {dimension_semantics = [#tpu.dimension_semantics<parallel>], iteration_bounds = array<i64: 1>, scalar_prefetch = 0 : i64, scratch_operands = 0 : i64, tpu.core_type = #tpu.core_type<tc>, window_params = [{transform_indices = @transform_0, window_bounds = array<i64: 2, 32>}, {pipeline_mode = #tpu.pipeline_mode<synchronous>, transform_indices = @transform_1, window_bounds = array<i64: 32, 32>}, {pipeline_mode = #tpu.pipeline_mode<synchronous>, transform_indices = @transform_2, window_bounds = array<i64: 1, 32>}, {pipeline_mode = #tpu.pipeline_mode<synchronous>, transform_indices = @transform_3, window_bounds = array<i64: 32, 32>}, {pipeline_mode = #tpu.pipeline_mode<synchronous>, transform_indices = @transform_4, window_bounds = array<i64: 1, 32>}, {pipeline_mode = #tpu.pipeline_mode<synchronous>, transform_indices = @transform_5, window_bounds = array<i64: 1, 32>}, {pipeline_mode = #tpu.pipeline_mode<synchronous>, transform_indices = @transform_6, window_bounds = array<i64: 1, 32>}, {transform_indices = @transform_7, window_bounds = array<i64: 2, 32>}]} {
    %c0 = arith.constant 0 : index
    %c0_0 = arith.constant 0 : index
    %0 = vector.load %arg1[%c0, %c0_0] : memref<2x32xf32, #tpu.memory_space<vmem>>, vector<2x32xf32>
    %c0_1 = arith.constant 0 : index
    %c0_2 = arith.constant 0 : index
    %1 = vector.load %arg2[%c0_1, %c0_2] : memref<32x32xf32, #tpu.memory_space<vmem>>, vector<32x32xf32>
    %cst = arith.constant dense<0.000000e+00> : vector<2x32xf32>
    %2 = tpu.matmul %0, %1, %cst {dimension_numbers = #tpu.dot_dimension_numbers<[1], [0], [0], [1], [0, 0, 1, 1], [], []>} : vector<2x32xf32>, vector<32x32xf32>, vector<2x32xf32> -> vector<2x32xf32>
    %c0_3 = arith.constant 0 : index
    %c0_4 = arith.constant 0 : index
    %3 = vector.load %arg3[%c0_3, %c0_4] : memref<1x32xf32, #tpu.memory_space<vmem>>, vector<1x32xf32>
    %4 = vector.broadcast %3 : vector<1x32xf32> to vector<2x32xf32>
    %5 = arith.addf %2, %4 : vector<2x32xf32>
    %cst_5 = arith.constant 0.000000e+00 : f32
    %6 = vector.broadcast %cst_5 : f32 to vector<2x32xf32>
    %7 = arith.maximumf %5, %6 : vector<2x32xf32>
    %c0_6 = arith.constant 0 : index
    %c0_7 = arith.constant 0 : index
    %8 = vector.load %arg4[%c0_6, %c0_7] : memref<32x32xf32, #tpu.memory_space<vmem>>, vector<32x32xf32>
    %cst_8 = arith.constant dense<0.000000e+00> : vector<2x32xf32>
    %9 = tpu.matmul %7, %8, %cst_8 {dimension_numbers = #tpu.dot_dimension_numbers<[1], [0], [0], [1], [0, 0, 1, 1], [], []>} : vector<2x32xf32>, vector<32x32xf32>, vector<2x32xf32> -> vector<2x32xf32>
    %c0_9 = arith.constant 0 : index
    %c0_10 = arith.constant 0 : index
    %10 = vector.load %arg5[%c0_9, %c0_10] : memref<1x32xf32, #tpu.memory_space<vmem>>, vector<1x32xf32>
    %11 = vector.broadcast %10 : vector<1x32xf32> to vector<2x32xf32>
    %12 = arith.addf %9, %11 : vector<2x32xf32>
    %cst_11 = arith.constant dense<0.000000e+00> : vector<2xf32>
    %13 = vector.multi_reduction <add>, %12, %cst_11 [1] : vector<2x32xf32> to vector<2xf32>
    %14 = vector.shape_cast %13 : vector<2xf32> to vector<2x1xf32>
    %cst_12 = arith.constant 3.200000e+01 : f32
    %15 = vector.broadcast %cst_12 : f32 to vector<2x1xf32>
    %16 = arith.divf %14, %15 : vector<2x1xf32>
    %17 = vector.broadcast %16 : vector<2x1xf32> to vector<2x32xf32>
    %18 = arith.subf %12, %17 : vector<2x32xf32>
    %19 = arith.mulf %18, %18 : vector<2x32xf32>
    %cst_13 = arith.constant dense<0.000000e+00> : vector<2xf32>
    %20 = vector.multi_reduction <add>, %19, %cst_13 [1] : vector<2x32xf32> to vector<2xf32>
    %21 = vector.shape_cast %20 : vector<2xf32> to vector<2x1xf32>
    %cst_14 = arith.constant 3.200000e+01 : f32
    %22 = vector.broadcast %cst_14 : f32 to vector<2x1xf32>
    %23 = arith.divf %21, %22 : vector<2x1xf32>
    %cst_15 = arith.constant 9.99999974E-6 : f32
    %24 = vector.broadcast %cst_15 : f32 to vector<2x1xf32>
    %25 = arith.addf %23, %24 : vector<2x1xf32>
    %26 = math.rsqrt %25 : vector<2x1xf32>
    %27 = vector.broadcast %26 : vector<2x1xf32> to vector<2x32xf32>
    %28 = arith.mulf %18, %27 : vector<2x32xf32>
    %c0_16 = arith.constant 0 : index
    %c0_17 = arith.constant 0 : index
    %29 = vector.load %arg6[%c0_16, %c0_17] : memref<1x32xf32, #tpu.memory_space<vmem>>, vector<1x32xf32>
    %30 = vector.broadcast %29 : vector<1x32xf32> to vector<2x32xf32>
    %31 = arith.mulf %28, %30 : vector<2x32xf32>
    %c0_18 = arith.constant 0 : index
    %c0_19 = arith.constant 0 : index
    %32 = vector.load %arg7[%c0_18, %c0_19] : memref<1x32xf32, #tpu.memory_space<vmem>>, vector<1x32xf32>
    %33 = vector.broadcast %32 : vector<1x32xf32> to vector<2x32xf32>
    %34 = arith.addf %31, %33 : vector<2x32xf32>
    %c0_20 = arith.constant 0 : index
    %c0_21 = arith.constant 0 : index
    %35 = vector.load %arg8[%c0_20, %c0_21] : memref<2x32xf32, #tpu.memory_space<vmem>>, vector<2x32xf32>
    tpu.vector_store %arg8[%c0_20, %c0_21], %34 {strides = array<i32>} : memref<2x32xf32, #tpu.memory_space<vmem>>, vector<2x32xf32>,
    return
  }
  func.func @transform_0(%arg0: i32) -> (i32, i32) {
    %c0_i32 = arith.constant 0 : i32
    %c0_i32_0 = arith.constant 0 : i32
    return %arg0, %c0_i32 : i32, i32
  }
  func.func @transform_1(%arg0: i32) -> (i32, i32) {
    %c0_i32 = arith.constant 0 : i32
    %c0_i32_0 = arith.constant 0 : i32
    %c0_i32_1 = arith.constant 0 : i32
    return %c0_i32, %c0_i32_0 : i32, i32
  }
  func.func @transform_2(%arg0: i32) -> (i32, i32) {
    %c0_i32 = arith.constant 0 : i32
    %c0_i32_0 = arith.constant 0 : i32
    %c0_i32_1 = arith.constant 0 : i32
    return %c0_i32, %c0_i32_0 : i32, i32
  }
  func.func @transform_3(%arg0: i32) -> (i32, i32) {
    %c0_i32 = arith.constant 0 : i32
    %c0_i32_0 = arith.constant 0 : i32
    %c0_i32_1 = arith.constant 0 : i32
    return %c0_i32, %c0_i32_0 : i32, i32
  }
  func.func @transform_4(%arg0: i32) -> (i32, i32) {
    %c0_i32 = arith.constant 0 : i32
    %c0_i32_0 = arith.constant 0 : i32
    %c0_i32_1 = arith.constant 0 : i32
    return %c0_i32, %c0_i32_0 : i32, i32
  }
  func.func @transform_5(%arg0: i32) -> (i32, i32) {
    %c0_i32 = arith.constant 0 : i32
    %c0_i32_0 = arith.constant 0 : i32
    %c0_i32_1 = arith.constant 0 : i32
    return %c0_i32, %c0_i32_0 : i32, i32
  }
  func.func @transform_6(%arg0: i32) -> (i32, i32) {
    %c0_i32 = arith.constant 0 : i32
    %c0_i32_0 = arith.constant 0 : i32
    %c0_i32_1 = arith.constant 0 : i32
    return %c0_i32, %c0_i32_0 : i32, i32
  }
  func.func @transform_7(%arg0: i32) -> (i32, i32) {
    %c0_i32 = arith.constant 0 : i32
    %c0_i32_0 = arith.constant 0 : i32
    return %arg0, %c0_i32 : i32, i32
  }
}

</mosaic_0001>

<bundles_post_ra>
// kernel: tpu_custom_call.1
= control target key start
LH: loop header
LB: loop body
LE: loop exit
PB: predicated region body
PF: predicated region fallthrough
CT: control target
= control target key end

     0   :  { %12 = vsyncpa [#allocation3], 0  ;;  %s389_s0 = inlined_call_operand.hbm [shape: f32[2,32], index: 0, kind: input, shape index: {}]   ;;  %s390_s1 = inlined_call_operand.hbm [shape: f32[32,32], index: 1, kind: input, shape index: {}]   ;;  %s391_s2 = inlined_call_operand.vmem [shape: f32[1,32], index: 2, kind: input, shape index: {}]   ;;  %s392_s3 = inlined_call_operand.hbm [shape: f32[32,32], index: 3, kind: input, shape index: {}]   ;;  %s393_s4 = inlined_call_operand.vmem [shape: f32[1,32], index: 4, kind: input, shape index: {}]   ;;  %s394_s5 = inlined_call_operand.vmem [shape: f32[1,32], index: 5, kind: input, shape index: {}]   ;;  %s395_s6 = inlined_call_operand.vmem [shape: f32[1,32], index: 6, kind: input, shape index: {}]   ;;  %s396_s7 = inlined_call_operand.hbm [shape: f32[2,32], index: 7, kind: output, shape index: {}]  }
   0x1   :  { %13 = vsyncpa [#allocation6], 0  ;;  %s30_s26 = sshll.u32 %s390_s1, 4  ;;  %s31_s26 = int_to_ptr.hbm [resolvable:$true] %s30_s26 }
   0x2   :  { %14 = vsyncpa [#allocation4], 0  ;;  %s315_s27 = smov [#allocation5]   ;;  %s20_s8 = sshll.u32 %s389_s0, 4  ;;  %s21_s8 = int_to_ptr.hbm [resolvable:$true] %s20_s8 }
   0x3   :  { %s32_s28 = sshll.u32 %s315_s27, 4  ;;  %s316_s9 = smov 128   ;;  %s33_s28 = int_to_ptr.vmem [resolvable:$true] %s32_s28 }
   0x4   :  { %s317_s10 = smov 8   ;;  %s318_s11 = smov [#allocation2]  }
   0x5   :  { %38 = dma.hbm_to_vmem [thread:$0]  %s31_s26, 512, %s33_s28, [#allocation6], %s316_s9, %s316_s9, %s317_s10  }
   0x6   :  { %s22_s12 = sshll.u32 %s318_s11, 4  ;;  %s45_s15 = sshll.u32 %s392_s3, 4  ;;  %s23_s12 = int_to_ptr.vmem [resolvable:$true] %s22_s12  ;;  %s46_s15 = int_to_ptr.hbm [resolvable:$true] %s45_s15 }
   0x7   :  { %25 = dma.hbm_to_vmem [thread:$0]  %s21_s8, 32, %s23_s12, [#allocation3]  }
   0x8   :  { %s319_s1 = smov [#allocation7]  }
   0x9   :  { %s47_s16 = sshll.u32 %s319_s1, 4  ;;  %s48_s16 = int_to_ptr.vmem [resolvable:$true] %s47_s16 }
   0xa   :  { %53 = dma.hbm_to_vmem [thread:$0]  %s46_s15, 512, %s48_s16, [#allocation6], %s316_s9, %s316_s9, %s317_s10  }
   0xb   :  { %309 = dma.done.wait [#allocation3], 32  }
   0xc   :  { %310 = vsyncadd [#allocation3], 4294967264 }
   0xd   :  { %311 = dma.done.wait [#allocation6], 1024  }
   0xe   :  { %312 = vsyncadd [#allocation6], 4294966272  ;;  %v76_v0 = vld [vmem:[#allocation5 + $0x18] sm:$0xff]  ;;  %v75_v1 = vld [vmem:[#allocation5 + $0x10] sm:$0xff]  ;;  %vm81_vm0 = vcmask 261120   ;;  %vm137_vm1 = vcmask 254976  }
   0xf   :  { %97 = vmatpush.msra.mxu0 %v76_v0  ;;  %v109_v2 = vld [vmem:[#allocation7 + $0x18] sm:$0xff]  ;;  %v74_v3 = vld [vmem:[#allocation5 + $0x8] sm:$0xff]  ;;  %v73_v4 = vld [vmem:[#allocation5] sm:$0xff]  ;;  %v320_v17 = vmov 32.0   ;;  %s321_s21 = smov [#allocation8]   ;;  %s185_s25 = sshll.u32 %s396_s7, 4  ;;  %s186_s25 = int_to_ptr.hbm [resolvable:$true] %s185_s25 }
  0x10   :  { %129 = vmatpush.msra.mxu1 %v109_v2  ;;  %v72_v5 = vld [vmem:[#allocation2] sm:$0x3]  ;;  %v108_v6 = vld [vmem:[#allocation7 + $0x10] sm:$0xff]  ;;  %v107_v7 = vld [vmem:[#allocation7 + $0x8] sm:$0xff]  ;;  %209 = vrcp.f32 %v320_v17  ;;  %s183_s22 = sshll.u32 %s321_s21, 4  ;;  %s184_s22 = int_to_ptr.vmem [resolvable:$true] %s183_s22 }
  0x11   :  { %98 = vmatpush.msra.mxu0 %v75_v1  ;;  %v106_v8 = vld [vmem:[#allocation7] sm:$0xff]  ;;  %v205_v9 = vld [vmem:[%s391_s2] ss:$0 sm:$0xff] }
  0x12   :  { %130 = vmatpush.msra.mxu1 %v108_v6  ;;  %v206_v13 = vld [vmem:[%s393_s4] ss:$0 sm:$0xff] }
  0x13   :  { %99 = vmatpush.msra.mxu0 %v74_v3  ;;  %v207_v38 = vld [vmem:[%s394_s5] ss:$0 sm:$0xff] }
  0x14   :  { %131 = vmatpush.msra.mxu1 %v107_v7  ;;  %v208_v41 = vld [vmem:[%s395_s6] ss:$0 sm:$0xff] }
  0x15   :  { %100 = vmatpush.msra.mxu0 %v73_v4 }
  0x16   :  { %196 = vmatmul.msk.f32.vlgmr.msra.gmra.mxu0 %vm81_vm0, %v72_v5  ;;  %132 = vmatpush.msra.mxu1 %v106_v8  ;;  %v210_v18 = vpop.eup %209 }
  0x17   :  { %v142_v19 = vmul.f32 32.0, %v210_v18  ;;  %vm146_vm2 = vweird.f32 %v210_v18 }
  0x19   :  { %v143_v20 = vsub.f32 1.0, %v142_v19 }
  0x1b   :  { %v144_v21 = vmul.f32 %v210_v18, %v143_v20 }
  0x1d   :  { %v145_v22 = vadd.f32 %v210_v18, %v144_v21 }
  0x1f   :  { %v147_v23 = vsel %vm146_vm2, %v210_v18, %v145_v22 }
  0x93   :  { %v102_v10 = vpop.f32.mrf.mxu0 }
  0x94   :  { %v103_v11 = vadd.f32 %v205_v9, %v102_v10 }
  0x96   :  { %v105_v12 = vmax.f32 %v103_v11, 0.0 }
  0x98   :  { %197 = vmatmul.msk.f32.vlgmr.msra.gmra.mxu1 %vm81_vm0, %v105_v12 }
 0x115   :  { %v134_v14 = vpop.f32.mrf.mxu1 }
 0x116   :  { %v135_v15 = vadd.f32 %v206_v13, %v134_v14 }
 0x118   :  { %v138_v16 = vsel %vm137_vm1, %v135_v15, 0.0 }
 0x119   :  { %139 = vadd.xlane.f32.xlu0 %v138_v16 }
 0x18c   :  { %v140_v24 = vpop.xlane.xlu0 %139 }
 0x18d   :  { %v148_v25 = vmul.f32 %v147_v23, %v140_v24 }
 0x18f   :  { %v149_v26 = vsub.f32 %v135_v15, %v148_v25 }
 0x191   :  { %v150_v27 = vmul.f32 %v149_v26, %v149_v26 }
 0x193   :  { %v151_v28 = vsel %vm137_vm1, %v150_v27, 0.0 }
 0x194   :  { %152 = vadd.xlane.f32.xlu0 %v151_v28 }
 0x207   :  { %v153_v29 = vpop.xlane.xlu0 %152 }
 0x208   :  { %v154_v30 = vmul.f32 %v153_v29, %v147_v23 }
 0x20a   :  { %v155_v31 = vadd.f32 1e-05, %v154_v30 }
 0x20c   :  { %211 = vrsqrt.f32 %v155_v31  ;;  %vm162_vm4 = vweird.f32 %v155_v31 }
 0x212   :  { %v212_v32 = vpop.eup %211 }
 0x213   :  { %v157_v33 = vmul.f32 %v212_v32, %v155_v31  ;;  %vm163_vm3 = vweird.f32 %v212_v32 }
 0x214   :  { %vm164_vm5 = vmor %vm162_vm4, %vm163_vm3 }
 0x215   :  { %v158_v34 = vmul.f32 %v212_v32, %v157_v33 }
 0x217   :  { %v159_v35 = vmul.f32 0.5, %v158_v34 }
 0x219   :  { %v160_v36 = vsub.f32 1.5, %v159_v35 }
 0x21b   :  { %v161_v37 = vmul.f32 %v212_v32, %v160_v36 }
 0x21d   :  { %v165_v39 = vsel %vm164_vm5, %v212_v32, %v161_v37 }
 0x21e   :  { %v166_v40 = vmul.f32 %v165_v39, %v149_v26 }
 0x220   :  { %v171_v42 = vmul.f32 %v207_v38, %v166_v40 }
 0x222   :  { %v176_v43 = vadd.f32 %v208_v41, %v171_v42 }
 0x224   :  { %177 = vst.msk [vmem:[#allocation8] sm:$0x3] %vm137_vm1, %v176_v43 }
 0x225   :  { %188 = dma.vmem_to_hbm [thread:$0]  %s184_s22, 32, %s186_s25, [#allocation4]  }
 0x226   :  { %313 = dma.done.wait [#allocation4], 32  }
 0x227   :  { %314 = vsyncadd [#allocation4], 4294967264 }
 0x228   :  { %193 = vsyncpa [#allocation3], 1 }
 0x229   :  { %194 = vsyncpa [#allocation6], 1 }
 0x22a   :  { %195 = vsyncpa [#allocation4], 1 }

</bundles_post_ra>
